<compile_context>
chip_gen: v5e
topology: v5e:2x2
jax: 0.10.0
libtpu: 0.0.40
codegen_flags: <defaults>
</compile_context>

<pallas_src>
import functools

import jax
import jax.numpy as jnp
from jax.experimental import pallas as pl
from jax.experimental.pallas import tpu as pltpu

NEG_SLOPE = 0.01  # nn.LeakyReLU default


def _leaky(v):
    return jnp.where(v > 0, v, NEG_SLOPE * v)


def _im2col_lanes(x2d, K, pad, dtype, cast_first):
    """x2d: (C, L) -> (K*C, L) im2col matrix.

    Row k*C + c holds the zero-padded x[c, l + k - pad]; the K taps are static
    lane slices of a once-built padded value, stacked along sublanes.
    `cast_first=True` casts to the compute dtype before building the K-times
    larger im2col matrix (cheaper when C is bf16-sublane-pack friendly).
    """
    if cast_first:
        x2d = x2d.astype(dtype)
    C, L = x2d.shape
    if pad > 0:
        z = jnp.zeros((C, pad), x2d.dtype)
        xp = jnp.concatenate([z, x2d, z], axis=1)           # (C, L + 2*pad)
    else:
        xp = x2d
    cols = jnp.concatenate([xp[:, k:k + L] for k in range(K)], axis=0)
    if not cast_first:
        cols = cols.astype(dtype)
    return cols


def basic_block_kernel(x_ref, w1_ref, t1_ref, w2_ref, t2_ref, out_ref, *,
                       ker_size, pad1, pad2, compute_dtype):
    """One grid step processes `nb` batch elements, NCL layout, fused along lanes.

    x_ref  : (nb, C_in, L)     f32
    w1_ref : (C_mid, K*C_in)   conv1 weight, BN1 scale folded; k-major/ci-minor
    t1_ref : (C_mid, 1)        folded conv1 bias + BN1 shift
    w2_ref : (C_out, K*C_mid)
    t2_ref : (C_out, 1)
    out_ref: (nb, C_out, L)
    """
    K = ker_size
    nb, c_in, L = x_ref.shape
    c_mid = w1_ref.shape[0]

    # Weights / shifts loaded (and cast) once per grid step.
    w1 = w1_ref[...].astype(compute_dtype)
    w2 = w2_ref[...].astype(compute_dtype)
    t1 = t1_ref[...]                         # (C_mid, 1) f32
    t2 = t2_ref[...]                         # (C_out, 1) f32

    is_lowp = jnp.dtype(compute_dtype) != jnp.dtype(jnp.float32)
    cast_first1 = is_lowp and (c_in % 16 == 0)    # bf16 sublane-pack friendly
    cast_first2 = is_lowp and (c_mid % 16 == 0)

    # ---- conv1 (+ folded bias/BN1) + act1: one lane-dense MXU matmul ----
    # Per-batch im2col matrices concatenated along lanes -> (K*C_in, nb*L).
    # TODO(synk): on v7x, K accumulating matmuls (MRB in-place accumulate)
    # could replace the im2col sublane-concat copies.
    cols1 = jnp.concatenate(
        [_im2col_lanes(x_ref[n], K, pad1, compute_dtype, cast_first1)
         for n in range(nb)], axis=1)
    h = jnp.dot(w1, cols1, preferred_element_type=jnp.float32) + t1
    h = _leaky(h)                                        # (C_mid, nb*L) f32

    # ---- conv2 (+ folded bias/BN2): per-batch-segment padding, one matmul ----
    cols2 = jnp.concatenate(
        [_im2col_lanes(h[:, n * L:(n + 1) * L], K, pad2, compute_dtype,
                       cast_first2)
         for n in range(nb)], axis=1)                    # (K*C_mid, nb*L)
    y = jnp.dot(w2, cols2, preferred_element_type=jnp.float32) + t2

    # ---- identity shortcut (downsample=None) + act2 ----
    for n in range(nb):                                  # static lane slices
        out_ref[n] = _leaky(y[:, n * L:(n + 1) * L]
                            + x_ref[n].astype(jnp.float32)).astype(out_ref.dtype)


def fold_params(w1_pt, b1, g1, be1, m1, v1,
                w2_pt, b2, g2, be2, m2, v2,
                eps=1e-5, weight_dtype=jnp.float32):
    """Fold conv bias + eval-mode BatchNorm into (weight, shift) per conv.

    BN(conv(x, w) + b) == conv(x, w * s) + ((b - m) * s + beta),
    s = gamma / sqrt(var + eps).  Weights returned as (C_out, K*C_in) with
    k-major / ci-minor columns, matching the kernel's im2col layout.
    """
    def fold(w_pt, b, g, be, m, v):
        s = g / jnp.sqrt(v + eps)
        t = (b - m) * s + be
        O, I, K = w_pt.shape
        wm = (w_pt * s[:, None, None]).transpose(0, 2, 1).reshape(O, K * I)
        return wm.astype(weight_dtype), t.reshape(O, 1).astype(jnp.float32)

    w1m, t1 = fold(w1_pt, b1, g1, be1, m1, v1)
    w2m, t2 = fold(w2_pt, b2, g2, be2, m2, v2)
    return w1m, t1, w2m, t2


def _pick_nb(N, L, c_in, c_mid, c_out, K, compute_itemsize, vmem_budget):
    """Batch elements per grid step: VMEM-budgeted, lane-dense, >=2 grid steps."""
    f32 = 4

    def step_bytes(nb):
        nl = nb * L
        io_blocks = 2 * (nb * c_in * L + nb * c_out * L) * f32   # dbl-buffered
        cols = K * (c_in + c_mid) * nl * compute_itemsize        # im2col slabs
        acts = (c_mid + c_out) * nl * f32                        # h, y
        wts = 2 * (c_mid * K * c_in + c_out * K * c_mid) * compute_itemsize
        return io_blocks + cols + acts + wts

    divisors = [d for d in range(1, N + 1) if N % d == 0]
    feasible = [d for d in divisors
                if step_bytes(d) <= vmem_budget
                and (N < 2 or N // d >= 2)]   # >=2 steps -> v7x 2-TC sharding
    if not feasible:
        feasible = [1]
    dense = [d for d in feasible if d * L >= 512]   # lane-density sweet spot
    nb = min(dense) if dense else max(feasible)
    return nb, step_bytes(nb)


def basic_block_pallas(x_ncl, w1m, t1, w2m, t2, *, ker_size, first_dilation,
                       dilation=1, stride=1, compute_dtype=jnp.float32,
                       out_dtype=None, vmem_budget_bytes=40 * 1024 * 1024):
    """x_ncl: (N, C_in, L) in PyTorch NCL layout. Returns (N, C_out, L)."""
    N, c_in, L = x_ncl.shape
    K = ker_size
    c_mid = w1m.shape[0]
    c_out = w2m.shape[0]
    out_dtype = x_ncl.dtype if out_dtype is None else out_dtype

    # Only the identity-shortcut configuration of the module is implemented.
    # TODO(synk): downsample / stride>1 / dilation>1 branch not implemented.
    assert stride == 1 and dilation == 1, "only stride=1, dilation=1 supported"
    assert K % 2 == 1, "even ker_size: pad=K//2 is not a 'same' conv (shape break)"
    assert first_dilation == K // 2, (
        "identity shortcut requires 'same' conv1 padding (first_dilation==K//2)")
    assert c_out == c_in and w1m.shape[1] == K * c_in and w2m.shape[1] == K * c_mid

    itemsize = jnp.dtype(compute_dtype).itemsize
    nb, est_bytes = _pick_nb(N, L, c_in, c_mid, c_out, K, itemsize,
                             vmem_budget_bytes)

    # Explicit scoped-VMEM limit (scoped default is 16/32 MiB; v7x physical 64).
    vmem_limit = int(min(56 * 2**20, max(32 * 2**20, 2 * est_bytes)))

    kernel = functools.partial(
        basic_block_kernel, ker_size=K, pad1=first_dilation, pad2=K // 2,
        compute_dtype=compute_dtype)

    grid_spec = pltpu.PrefetchScalarGridSpec(
        num_scalar_prefetch=0,
        grid=(N // nb,),
        in_specs=[
            pl.BlockSpec((nb, c_in, L), lambda b: (b, 0, 0)),
            pl.BlockSpec((c_mid, K * c_in), lambda b: (0, 0)),
            pl.BlockSpec((c_mid, 1), lambda b: (0, 0)),
            pl.BlockSpec((c_out, K * c_mid), lambda b: (0, 0)),
            pl.BlockSpec((c_out, 1), lambda b: (0, 0)),
        ],
        out_specs=pl.BlockSpec((nb, c_out, L), lambda b: (b, 0, 0)),
    )
    # TODO(synk): for very long L, tile the length axis with a (K-1)-element
    # halo (~512-2048 lanes per tile) instead of loading full L per grid step.
    return pl.pallas_call(
        kernel,
        out_shape=jax.ShapeDtypeStruct((N, c_out, L), out_dtype),
        grid_spec=grid_spec,
        compiler_params=pltpu.CompilerParams(
            dimension_semantics=("parallel",),
            vmem_limit_bytes=vmem_limit),
    )(x_ncl, w1m, t1, w2m, t2)


# ---------- pure-JAX reference (PyTorch semantics, eval-mode BN) ----------
def _conv1d_ref(x_ncl, w_oik, b, pad):
    y = jax.lax.conv_general_dilated(
        x_ncl, w_oik, window_strides=(1,), padding=[(pad, pad)],
        dimension_numbers=('NCH', 'OIH', 'NCH'))
    return y + b[None, :, None]


def basic_block_ref(x, pt_params, ker_size, first_dilation, eps=1e-5):
    (w1, b1, g1, be1, m1, v1, w2, b2, g2, be2, m2, v2) = pt_params
    h = _conv1d_ref(x, w1, b1, first_dilation)
    h = (h - m1[None, :, None]) / jnp.sqrt(v1[None, :, None] + eps) \
        * g1[None, :, None] + be1[None, :, None]
    h = _leaky(h)
    y = _conv1d_ref(h, w2, b2, ker_size // 2)
    y = (y - m2[None, :, None]) / jnp.sqrt(v2[None, :, None] + eps) \
        * g2[None, :, None] + be2[None, :, None]
    y = y + x   # downsample=None -> identity shortcut
    return _leaky(y)


if __name__ == "__main__":
    # Config: inplanes=planes=16 (identity shortcut), ker_size=3, stride=1,
    # dilation=1, first_dilation(=padding)=1, downsample=None.
    N, C, L, K = 4, 16, 64, 3
    first_dilation = K // 2
    eps = 1e-5

    key = jax.random.PRNGKey(0)
    ks = jax.random.split(key, 13)

    x = jax.random.normal(ks[0], (N, C, L), jnp.float32)

    # PyTorch-shaped parameters: (O, I, K) conv weights, per-channel BN params.
    w1_pt = jax.random.normal(ks[1], (C, C, K), jnp.float32) * 0.2
    b1_pt = jax.random.normal(ks[2], (C,), jnp.float32) * 0.1
    g1 = jax.random.uniform(ks[3], (C,), jnp.float32, 0.5, 1.5)
    be1 = jax.random.normal(ks[4], (C,), jnp.float32) * 0.1
    m1 = jax.random.normal(ks[5], (C,), jnp.float32) * 0.1
    v1 = jax.random.uniform(ks[6], (C,), jnp.float32, 0.5, 1.5)

    w2_pt = jax.random.normal(ks[7], (C, C, K), jnp.float32) * 0.2
    b2_pt = jax.random.normal(ks[8], (C,), jnp.float32) * 0.1
    g2 = jax.random.uniform(ks[9], (C,), jnp.float32, 0.5, 1.5)
    be2 = jax.random.normal(ks[10], (C,), jnp.float32) * 0.1
    m2 = jax.random.normal(ks[11], (C,), jnp.float32) * 0.1
    v2 = jax.random.uniform(ks[12], (C,), jnp.float32, 0.5, 1.5)

    pt_params = (w1_pt, b1_pt, g1, be1, m1, v1,
                 w2_pt, b2_pt, g2, be2, m2, v2)
    ref = basic_block_ref(x, pt_params, ker_size=K,
                          first_dilation=first_dilation, eps=eps)

    # ---- f32 path: exact check vs. PyTorch-semantics reference ----
    w1m, t1, w2m, t2 = fold_params(*pt_params, eps=eps)
    run_f32 = jax.jit(functools.partial(
        basic_block_pallas, ker_size=K, first_dilation=first_dilation))
    out = jax.block_until_ready(run_f32(x, w1m, t1, w2m, t2))
    assert out.shape == (N, C, L)
    max_err = jnp.max(jnp.abs(out - ref))
    assert jnp.allclose(out, ref, atol=1e-4, rtol=1e-4), (
        f"f32 max abs err {max_err}")

    # ---- bf16-MXU path (halves matmul operand bytes on all generations;
    #      f32 epilogue / residual / output) ----
    w1b, t1b, w2b, t2b = fold_params(*pt_params, eps=eps,
                                     weight_dtype=jnp.bfloat16)
    run_bf16 = jax.jit(functools.partial(
        basic_block_pallas, ker_size=K, first_dilation=first_dilation,
        compute_dtype=jnp.bfloat16))
    out_bf16 = jax.block_until_ready(run_bf16(x, w1b, t1b, w2b, t2b))
    rel_err = jnp.max(jnp.abs(out_bf16 - ref)) / jnp.maximum(
        jnp.max(jnp.abs(ref)), 1e-6)
    assert rel_err < 5e-2, f"bf16 relative err {rel_err}"

    print("KERNEL_OK")
</pallas_src>

<mosaic_0001>
module attributes {stable_mosaic.version = 11 : i64} {
  func.func @basic_block_kernel(%arg0: i32, %arg1: memref<2x16x64xf32, #tpu.memory_space<vmem>>, %arg2: memref<16x48xf32, #tpu.memory_space<vmem>>, %arg3: memref<16x1xf32, #tpu.memory_space<vmem>>, %arg4: memref<16x48xf32, #tpu.memory_space<vmem>>, %arg5: memref<16x1xf32, #tpu.memory_space<vmem>>, %arg6: memref<2x16x64xf32, #tpu.memory_space<vmem>>) attributes {dimension_semantics = [#tpu.dimension_semantics<parallel>], iteration_bounds = array<i64: 2>, scalar_prefetch = 0 : i64, scratch_operands = 0 : i64, tpu.core_type = #tpu.core_type<tc>, window_params = [{transform_indices = @transform_0, window_bounds = array<i64: 2, 16, 64>}, {pipeline_mode = #tpu.pipeline_mode<synchronous>, transform_indices = @transform_1, window_bounds = array<i64: 16, 48>}, {pipeline_mode = #tpu.pipeline_mode<synchronous>, transform_indices = @transform_2, window_bounds = array<i64: 16, 1>}, {pipeline_mode = #tpu.pipeline_mode<synchronous>, transform_indices = @transform_3, window_bounds = array<i64: 16, 48>}, {pipeline_mode = #tpu.pipeline_mode<synchronous>, transform_indices = @transform_4, window_bounds = array<i64: 16, 1>}, {transform_indices = @transform_5, window_bounds = array<i64: 2, 16, 64>}]} {
    %c0 = arith.constant 0 : index
    %c0_0 = arith.constant 0 : index
    %0 = vector.load %arg2[%c0, %c0_0] : memref<16x48xf32, #tpu.memory_space<vmem>>, vector<16x48xf32>
    %c0_1 = arith.constant 0 : index
    %c0_2 = arith.constant 0 : index
    %1 = vector.load %arg4[%c0_1, %c0_2] : memref<16x48xf32, #tpu.memory_space<vmem>>, vector<16x48xf32>
    %c0_3 = arith.constant 0 : index
    %c0_4 = arith.constant 0 : index
    %2 = vector.load %arg3[%c0_3, %c0_4] : memref<16x1xf32, #tpu.memory_space<vmem>>, vector<16x1xf32>
    %c0_5 = arith.constant 0 : index
    %c0_6 = arith.constant 0 : index
    %3 = vector.load %arg5[%c0_5, %c0_6] : memref<16x1xf32, #tpu.memory_space<vmem>>, vector<16x1xf32>
    %c0_7 = arith.constant 0 : index
    %c0_8 = arith.constant 0 : index
    %c0_9 = arith.constant 0 : index
    %4 = vector.load %arg1[%c0_7, %c0_8, %c0_9] : memref<2x16x64xf32, #tpu.memory_space<vmem>>, vector<1x16x64xf32>
    %5 = vector.shape_cast %4 : vector<1x16x64xf32> to vector<16x64xf32>
    %cst = arith.constant 0.000000e+00 : f32
    %6 = vector.broadcast %cst : f32 to vector<16x1xf32>
    %7 = tpu.concatenate %6, %5, %6 in 1 : vector<16x1xf32>, vector<16x64xf32>, vector<16x1xf32> -> vector<16x66xf32>
    %8 = vector.extract_strided_slice %7 {offsets = [0, 0], sizes = [16, 64], strides = [1, 1]} : vector<16x66xf32> to vector<16x64xf32>
    %9 = vector.extract_strided_slice %7 {offsets = [0, 1], sizes = [16, 64], strides = [1, 1]} : vector<16x66xf32> to vector<16x64xf32>
    %10 = vector.extract_strided_slice %7 {offsets = [0, 2], sizes = [16, 64], strides = [1, 1]} : vector<16x66xf32> to vector<16x64xf32>
    %11 = tpu.concatenate %8, %9, %10 in 0 : vector<16x64xf32>, vector<16x64xf32>, vector<16x64xf32> -> vector<48x64xf32>
    %c1 = arith.constant 1 : index
    %c0_10 = arith.constant 0 : index
    %c0_11 = arith.constant 0 : index
    %12 = vector.load %arg1[%c1, %c0_10, %c0_11] : memref<2x16x64xf32, #tpu.memory_space<vmem>>, vector<1x16x64xf32>
    %13 = vector.shape_cast %12 : vector<1x16x64xf32> to vector<16x64xf32>
    %cst_12 = arith.constant 0.000000e+00 : f32
    %14 = vector.broadcast %cst_12 : f32 to vector<16x1xf32>
    %15 = tpu.concatenate %14, %13, %14 in 1 : vector<16x1xf32>, vector<16x64xf32>, vector<16x1xf32> -> vector<16x66xf32>
    %16 = vector.extract_strided_slice %15 {offsets = [0, 0], sizes = [16, 64], strides = [1, 1]} : vector<16x66xf32> to vector<16x64xf32>
    %17 = vector.extract_strided_slice %15 {offsets = [0, 1], sizes = [16, 64], strides = [1, 1]} : vector<16x66xf32> to vector<16x64xf32>
    %18 = vector.extract_strided_slice %15 {offsets = [0, 2], sizes = [16, 64], strides = [1, 1]} : vector<16x66xf32> to vector<16x64xf32>
    %19 = tpu.concatenate %16, %17, %18 in 0 : vector<16x64xf32>, vector<16x64xf32>, vector<16x64xf32> -> vector<48x64xf32>
    %20 = tpu.concatenate %11, %19 in 1 : vector<48x64xf32>, vector<48x64xf32> -> vector<48x128xf32>
    %cst_13 = arith.constant dense<0.000000e+00> : vector<16x128xf32>
    %21 = tpu.matmul %0, %20, %cst_13 {dimension_numbers = #tpu.dot_dimension_numbers<[1], [0], [0], [1], [0, 0, 1, 1], [], []>} : vector<16x48xf32>, vector<48x128xf32>, vector<16x128xf32> -> vector<16x128xf32>
    %22 = vector.broadcast %2 : vector<16x1xf32> to vector<16x128xf32>
    %23 = arith.addf %21, %22 : vector<16x128xf32>
    %cst_14 = arith.constant 0.000000e+00 : f32
    %24 = vector.broadcast %cst_14 : f32 to vector<16x128xf32>
    %25 = arith.cmpf ogt, %23, %24 : vector<16x128xf32>
    %cst_15 = arith.constant 0.00999999977 : f32
    %26 = vector.broadcast %cst_15 : f32 to vector<16x128xf32>
    %27 = arith.mulf %26, %23 : vector<16x128xf32>
    %28 = arith.select %25, %23, %27 : vector<16x128xi1>, vector<16x128xf32>
    %29 = vector.extract_strided_slice %28 {offsets = [0, 0], sizes = [16, 64], strides = [1, 1]} : vector<16x128xf32> to vector<16x64xf32>
    %cst_16 = arith.constant 0.000000e+00 : f32
    %30 = vector.broadcast %cst_16 : f32 to vector<16x1xf32>
    %31 = tpu.concatenate %30, %29, %30 in 1 : vector<16x1xf32>, vector<16x64xf32>, vector<16x1xf32> -> vector<16x66xf32>
    %32 = vector.extract_strided_slice %31 {offsets = [0, 0], sizes = [16, 64], strides = [1, 1]} : vector<16x66xf32> to vector<16x64xf32>
    %33 = vector.extract_strided_slice %31 {offsets = [0, 1], sizes = [16, 64], strides = [1, 1]} : vector<16x66xf32> to vector<16x64xf32>
    %34 = vector.extract_strided_slice %31 {offsets = [0, 2], sizes = [16, 64], strides = [1, 1]} : vector<16x66xf32> to vector<16x64xf32>
    %35 = tpu.concatenate %32, %33, %34 in 0 : vector<16x64xf32>, vector<16x64xf32>, vector<16x64xf32> -> vector<48x64xf32>
    %36 = vector.extract_strided_slice %28 {offsets = [0, 64], sizes = [16, 64], strides = [1, 1]} : vector<16x128xf32> to vector<16x64xf32>
    %cst_17 = arith.constant 0.000000e+00 : f32
    %37 = vector.broadcast %cst_17 : f32 to vector<16x1xf32>
    %38 = tpu.concatenate %37, %36, %37 in 1 : vector<16x1xf32>, vector<16x64xf32>, vector<16x1xf32> -> vector<16x66xf32>
    %39 = vector.extract_strided_slice %38 {offsets = [0, 0], sizes = [16, 64], strides = [1, 1]} : vector<16x66xf32> to vector<16x64xf32>
    %40 = vector.extract_strided_slice %38 {offsets = [0, 1], sizes = [16, 64], strides = [1, 1]} : vector<16x66xf32> to vector<16x64xf32>
    %41 = vector.extract_strided_slice %38 {offsets = [0, 2], sizes = [16, 64], strides = [1, 1]} : vector<16x66xf32> to vector<16x64xf32>
    %42 = tpu.concatenate %39, %40, %41 in 0 : vector<16x64xf32>, vector<16x64xf32>, vector<16x64xf32> -> vector<48x64xf32>
    %43 = tpu.concatenate %35, %42 in 1 : vector<48x64xf32>, vector<48x64xf32> -> vector<48x128xf32>
    %cst_18 = arith.constant dense<0.000000e+00> : vector<16x128xf32>
    %44 = tpu.matmul %1, %43, %cst_18 {dimension_numbers = #tpu.dot_dimension_numbers<[1], [0], [0], [1], [0, 0, 1, 1], [], []>} : vector<16x48xf32>, vector<48x128xf32>, vector<16x128xf32> -> vector<16x128xf32>
    %45 = vector.broadcast %3 : vector<16x1xf32> to vector<16x128xf32>
    %46 = arith.addf %44, %45 : vector<16x128xf32>
    %47 = vector.extract_strided_slice %46 {offsets = [0, 0], sizes = [16, 64], strides = [1, 1]} : vector<16x128xf32> to vector<16x64xf32>
    %c0_19 = arith.constant 0 : index
    %c0_20 = arith.constant 0 : index
    %c0_21 = arith.constant 0 : index
    %48 = vector.load %arg1[%c0_19, %c0_20, %c0_21] : memref<2x16x64xf32, #tpu.memory_space<vmem>>, vector<1x16x64xf32>
    %49 = vector.shape_cast %48 : vector<1x16x64xf32> to vector<16x64xf32>
    %50 = arith.addf %47, %49 : vector<16x64xf32>
    %cst_22 = arith.constant 0.000000e+00 : f32
    %51 = vector.broadcast %cst_22 : f32 to vector<16x64xf32>
    %52 = arith.cmpf ogt, %50, %51 : vector<16x64xf32>
    %cst_23 = arith.constant 0.00999999977 : f32
    %53 = vector.broadcast %cst_23 : f32 to vector<16x64xf32>
    %54 = arith.mulf %53, %50 : vector<16x64xf32>
    %55 = arith.select %52, %50, %54 : vector<16x64xi1>, vector<16x64xf32>
    %c0_24 = arith.constant 0 : index
    %c0_25 = arith.constant 0 : index
    %c0_26 = arith.constant 0 : index
    %56 = vector.load %arg6[%c0_24, %c0_25, %c0_26] : memref<2x16x64xf32, #tpu.memory_space<vmem>>, vector<1x16x64xf32>
    %57 = vector.shape_cast %56 : vector<1x16x64xf32> to vector<16x64xf32>
    %58 = vector.shape_cast %55 : vector<16x64xf32> to vector<1x16x64xf32>
    tpu.vector_store %arg6[%c0_24, %c0_25, %c0_26], %58 {strides = array<i32>} : memref<2x16x64xf32, #tpu.memory_space<vmem>>, vector<1x16x64xf32>,
    %59 = vector.extract_strided_slice %46 {offsets = [0, 64], sizes = [16, 64], strides = [1, 1]} : vector<16x128xf32> to vector<16x64xf32>
    %c1_27 = arith.constant 1 : index
    %c0_28 = arith.constant 0 : index
    %c0_29 = arith.constant 0 : index
    %60 = vector.load %arg1[%c1_27, %c0_28, %c0_29] : memref<2x16x64xf32, #tpu.memory_space<vmem>>, vector<1x16x64xf32>
    %61 = vector.shape_cast %60 : vector<1x16x64xf32> to vector<16x64xf32>
    %62 = arith.addf %59, %61 : vector<16x64xf32>
    %cst_30 = arith.constant 0.000000e+00 : f32
    %63 = vector.broadcast %cst_30 : f32 to vector<16x64xf32>
    %64 = arith.cmpf ogt, %62, %63 : vector<16x64xf32>
    %cst_31 = arith.constant 0.00999999977 : f32
    %65 = vector.broadcast %cst_31 : f32 to vector<16x64xf32>
    %66 = arith.mulf %65, %62 : vector<16x64xf32>
    %67 = arith.select %64, %62, %66 : vector<16x64xi1>, vector<16x64xf32>
    %c1_32 = arith.constant 1 : index
    %c0_33 = arith.constant 0 : index
    %c0_34 = arith.constant 0 : index
    %68 = vector.load %arg6[%c1_32, %c0_33, %c0_34] : memref<2x16x64xf32, #tpu.memory_space<vmem>>, vector<1x16x64xf32>
    %69 = vector.shape_cast %68 : vector<1x16x64xf32> to vector<16x64xf32>
    %70 = vector.shape_cast %67 : vector<16x64xf32> to vector<1x16x64xf32>
    tpu.vector_store %arg6[%c1_32, %c0_33, %c0_34], %70 {strides = array<i32>} : memref<2x16x64xf32, #tpu.memory_space<vmem>>, vector<1x16x64xf32>,
    return
  }
  func.func @transform_0(%arg0: i32) -> (i32, i32, i32) {
    %c0_i32 = arith.constant 0 : i32
    %c0_i32_0 = arith.constant 0 : i32
    %c0_i32_1 = arith.constant 0 : i32
    return %arg0, %c0_i32, %c0_i32_0 : i32, i32, i32
  }
  func.func @transform_1(%arg0: i32) -> (i32, i32) {
    %c0_i32 = arith.constant 0 : i32
    %c0_i32_0 = arith.constant 0 : i32
    %c0_i32_1 = arith.constant 0 : i32
    return %c0_i32, %c0_i32_0 : i32, i32
  }
  func.func @transform_2(%arg0: i32) -> (i32, i32) {
    %c0_i32 = arith.constant 0 : i32
    %c0_i32_0 = arith.constant 0 : i32
    %c0_i32_1 = arith.constant 0 : i32
    return %c0_i32, %c0_i32_0 : i32, i32
  }
  func.func @transform_3(%arg0: i32) -> (i32, i32) {
    %c0_i32 = arith.constant 0 : i32
    %c0_i32_0 = arith.constant 0 : i32
    %c0_i32_1 = arith.constant 0 : i32
    return %c0_i32, %c0_i32_0 : i32, i32
  }
  func.func @transform_4(%arg0: i32) -> (i32, i32) {
    %c0_i32 = arith.constant 0 : i32
    %c0_i32_0 = arith.constant 0 : i32
    %c0_i32_1 = arith.constant 0 : i32
    return %c0_i32, %c0_i32_0 : i32, i32
  }
  func.func @transform_5(%arg0: i32) -> (i32, i32, i32) {
    %c0_i32 = arith.constant 0 : i32
    %c0_i32_0 = arith.constant 0 : i32
    %c0_i32_1 = arith.constant 0 : i32
    return %arg0, %c0_i32, %c0_i32_0 : i32, i32, i32
  }
}

</mosaic_0001>

<bundles_post_ra>
// kernel: basic_block_pallas.1
= control target key start
LH: loop header
LB: loop body
LE: loop exit
PB: predicated region body
PF: predicated region fallthrough
CT: control target
= control target key end

     0   :  { %10 = vsyncpa [#allocation3], 0  ;;  %s1176_s0 = inlined_call_operand.hbm [shape: f32[4,16,64], index: 0, kind: input, shape index: {}]   ;;  %s1177_s1 = inlined_call_operand.vmem [shape: f32[16,48], index: 1, kind: input, shape index: {}]   ;;  %s1178_s2 = inlined_call_operand.vmem [shape: f32[16,1], index: 2, kind: input, shape index: {}]   ;;  %s1179_s3 = inlined_call_operand.vmem [shape: f32[16,48], index: 3, kind: input, shape index: {}]   ;;  %s1180_s4 = inlined_call_operand.vmem [shape: f32[16,1], index: 4, kind: input, shape index: {}]   ;;  %s1181_s5 = inlined_call_operand.hbm [shape: f32[4,16,64], index: 5, kind: output, shape index: {}]  }
   0x1   :  { %12 = vsyncpa [#allocation3 + $0x1], 0 }
   0x2   :  { %13 = vsyncpa [#allocation4], 0 }
   0x3   :  { %15 = vsyncpa [#allocation4 + $0x1], 0  ;;  %s948_s18 = smov 0   ;;  %s950_s19 = smov 0  }
   0x4   :  { %s952_s20 = smov 0   ;;  %s954_s21 = smov 0  }
   0x5 LB: > { %s969_s22 = sadd.s32 4294967295, %s906_s21   ;;  %s620_s23 = sadd.s32 4294967294, %s906_s21   ;;  %s906_s21 = sphi %s954_s21, %s1191_s21   ;;  %s902_s20 = sphi %s952_s20, %s1190_s20   ;;  %s898_s19 = sphi %s950_s19, %s1189_s19   ;;  %s894_s18 = sphi %s948_s18, %s1188_s18  }
   0x6   : > { %s973_s24 = sadd.s32 1, %s906_s21   ;;  %s28_s25 = sadd.s32 1, %s902_s20 }
   0x7   : > { %s25_s26 = ssub.s32 %s906_s21, %s973_s24  ;;  %p35_p0 = scmp.ne.s32.totalorder %s902_s20, %s898_s19 }
   0x8   : > { %p26_p1 = scmp.eq.s32.totalorder %s25_s26, 0  ;;  %p36_p2 = scmp.eq.s32.totalorder %s906_s21, 0 }
   0x9   : > { %p41_p3 = scmp.ne.s32.totalorder %s898_s19, %s894_s18  ;;  %p42_p4 = scmp.eq.s32.totalorder %s969_s22, 0 }
   0xa   : > { %s985_s27 = scalar_select %p26_p1, %s902_s20, %s28_s25  }
   0xb   : > { %p987_p5 = por %p36_p2, %p35_p0  ;;  %p991_p6 = por %p42_p4, %p41_p3 }
   0xc   : > { %p149_p7 = scmp.eq.s32.totalorder %s969_s22, 1  ;;  %p155_p8 = scmp.eq.s32.totalorder %s620_s23, 1 }
   0xd   : > { %p674_p10 = scmp.lt.s32.totalorder %s906_s21, 2  ;;  %s187_s7 = sand.u32 1, %s902_s20  }
   0xe   : > { %p998_p11 = por %p149_p7, %p35_p0  ;;  %p1002_p12 = por %p155_p8, %p41_p3 }
   0xf   : > { %s647_s8 = sshll.u32 %s906_s21, 5  ;;  %s623_s9 = sshll.u32 %s187_s7, 5 }
  0x10   : > { %s197_s12 = scalar_lea.hbm %s1176_s0, %s647_s8  ;;  %s191_s14 = scalar_lea.vmem [#allocation2], %s623_s9 }
  0x11   : > { %s198_s13 = sshll.u32 %s197_s12, 4  ;;  %s200_s15 = sshll.u32 %s191_s14, 4  ;;  %s199_s13 = int_to_ptr.hbm [resolvable:$true] %s198_s13  ;;  %s201_s15 = int_to_ptr.vmem [resolvable:$true] %s200_s15 }
  0x12   : > { %p1013_p13 = pnand %p674_p10, %p987_p5  ;;  %p627_p0 = scmp.ge.s32.totalorder %s906_s21, 1 }
  0x13   : > { %p208_p1 = scmp.lt.s32.totalorder %s906_s21, 3  ;;  %s188_s17 = scalar_lea.sflag [#allocation3], %s187_s7 }
  0x14   : > { %s810_s23 = sshra.s32 %s199_s13, 4  ;;  %p814_p3 = pneg %p1013_p13  ;;  %s811_s23 = int_to_ptr.hbm [resolvable:$true] %s810_s23 }
  0x15   : > { %s812_s25 = scalar_lea.hbm %s811_s23, 32  ;;  %s817_s28 = scalar_lea.hbm %s1176_s0, 64 }
  0x16   : > { %p813_p2 = scmp.ne.s32.totalorder %s811_s23, %s812_s25  ;;  %p818_p5 = scmp.lt.s32.totalorder %s811_s23, %s1176_s0 }
  0x17   : > { %p819_p8 = scmp.lt.s32.totalorder %s817_s28, %s812_s25 }
  0x18   : > { %p815_p4 = pnand %p814_p3, %p813_p2 }
  0x19   : > { %p820_p10 = por %p819_p8, %p818_p5 }
  0x1a   : > { %p816_p7 = pneg %p815_p4 }
  0x1c   : > { %p821_p9 = pnand %p820_p10, %p816_p7 }
  0x1e   : > { %824 = shalt.err (!%p821_p9)
}
  0x1f   : > { %s908_s7 = smov 128   ;;  %s909_s11 = smov 8  }
  0x20   : > { %669 = dma.hbm_to_vmem [thread:$0]  (!%p1013_p13), %s199_s13, 512, %s201_s15, %s188_s17, %s908_s7, %s908_s7, %s909_s11  }
  0x21   : > { %p209_p2 = pnand %p627_p0, %p208_p1 }
  0x22   : > { %s1034_s12 = sand.u32 (!%p209_p2), 1, %s898_s19  }
  0x23   : > { %212 = sbr.rel (%p209_p2) target bundleno = 1141 (0x475), region = 40  ;;  %s628_s14 = sshll.u32 (!%p209_p2), %s1034_s12, 5 }
  0x24   : > { %s215_s23 = scalar_lea.sflag (!%p209_p2), [#allocation3], %s1034_s12  ;;  %s218_s25 = scalar_lea.vmem (!%p209_p2), [#allocation2], %s628_s14 }
  0x28   : > { %885 = dma.done.wait (%p991_p6), %s215_s23, 512  }
  0x29   : > { %887 = vsyncadd (%p991_p6), %s215_s23, 4294966784  ;;  %v1044_v0 = vld [vmem:[%s218_s25 + $0x10] sm:$0xff]  ;;  %v1046_v1 = vld [vmem:[%s218_s25 + $0x18] sm:$0xff]  ;;  %s910_s13 = smov 1   ;;  %vm266_vm0 = vcmask 7168   ;;  %vm269_vm1 = vcmask 531456  }
  0x2a   : > { %v718_v2 = vpack.i.bf16 %v1044_v0, %v1046_v1  ;;  %v1051_v3 = vld [vmem:[%s218_s25] sm:$0xff]  ;;  %v1053_v4 = vld [vmem:[%s218_s25 + $0x8] sm:$0xff]  ;;  %s911_s29 = smov 126   ;;  %s912_s15 = smov 127   ;;  %vm329_vm2 = vcmask 523264   ;;  %v914_v34 = vmov 0  }
  0x2b   : > { %v723_v5 = vpack.i.bf16 %v1051_v3, %v1053_v4  ;;  %s913_s16 = smov 64   ;;  %v252_v32 = vld [vmem:[%s1178_s2] sm:$0xff]  ;;  %v253_v33 = vld [vmem:[%s1178_s2 + $0x8] sm:$0xff]  ;;  %764 = vset.pattern.permute.xlu1 %v914_v34  ;;  %763 = vset.pattern.permute.xlu0 %v914_v34  ;;  %vm346_vm3 = vcmask 392192   ;;  %s915_s23 = smov 65  }
  0x2c   : > { %719 = vrot.lane.b32.xlu0 %v718_v2, %s910_s13  ;;  %v249_v47 = vld [vmem:[%s1177_s1 + $0x8] sm:$0xff]  ;;  %v248_v48 = vld [vmem:[%s1177_s1] sm:$0xff]  ;;  %s245_s9 = scalar_lea.vmem [#allocation5], %s628_s14  ;;  %s649_s14 = sshll.u32 %s969_s22, 5 }
  0x2d   : > { %s543_s11 = scalar_lea.hbm %s1181_s5, %s649_s14  ;;  %s860_s17 = scalar_lea.hbm %s1181_s5, 64 }
  0x2e   : > { %s546_s25 = sshll.u32 %s543_s11, 4  ;;  %s547_s25 = int_to_ptr.hbm [resolvable:$true] %s546_s25 }
  0x34   : > { %724 = vrot.lane.b32.xlu0 %v723_v5, %s910_s13 }
  0x9e   : > { %v720_v6 = vpop.permute.xlu0 %719 }
  0x9f   : > { %v722_v7 = vunpack.i.h.bf16 %v720_v6  ;;  %v721_v8 = vunpack.i.l.bf16 %v720_v6 }
  0xa1   : > { %v297_v9 = vsel %vm266_vm0, 0.0, %v722_v7  ;;  %v298_v10 = vsel %vm266_vm0, 0.0, %v721_v8 }
  0xa2   : > { %v299_v11 = vsel %vm269_vm1, %v297_v9, 0.0  ;;  %v300_v12 = vsel %vm269_vm1, %v298_v10, 0.0 }
  0xa3   : > { %v728_v13 = vpack.i.bf16 %v299_v11, %v300_v12 }
  0xa5   : > { %729 = vrot.lane.b32.xlu1 %v728_v13, %s911_s29 }
  0xa6   : > { %v725_v14 = vpop.permute.xlu0 %724 }
  0xa7   : > { %v727_v15 = vunpack.i.h.bf16 %v725_v14  ;;  %v726_v16 = vunpack.i.l.bf16 %v725_v14 }
  0xa9   : > { %v267_v17 = vsel %vm266_vm0, 0.0, %v727_v15  ;;  %v268_v18 = vsel %vm266_vm0, 0.0, %v726_v16 }
  0xaa   : > { %v270_v19 = vsel %vm269_vm1, %v267_v17, 0.0  ;;  %v271_v20 = vsel %vm269_vm1, %v268_v18, 0.0  ;;  %v254_v17 = vld [vmem:[%s1180_s4] sm:$0xff] }
  0xab   : > { %v738_v21 = vpack.i.bf16 %v270_v19, %v271_v20 }
  0xad   : > { %734 = vrot.lane.b32.xlu1 %v728_v13, %s912_s15  ;;  %739 = vrot.lane.b32.xlu2 %v738_v21, %s911_s29 }
  0xae   : > { %744 = vrot.lane.b32.xlu0 %v738_v21, %s912_s15 }
  0xb6   : > { %343 = vperm.xlu0 %763, %v253_v33  }
 0x107   : > { %v740_v24 = vpop.permute.xlu2 %739 }
 0x108   : > { %v741_v25 = vunpack.i.l.bf16 %v740_v24  ;;  %v742_v27 = vunpack.i.h.bf16 %v740_v24 }
 0x117   : > { %v730_v22 = vpop.permute.xlu1 %729 }
 0x118   : > { %749 = vrot.lane.b32.xlu2 %v730_v22, %s913_s16 }
 0x11f   : > { %v735_v23 = vpop.permute.xlu1 %734 }
 0x120   : > { %754 = vrot.lane.b32.xlu1 %v735_v23, %s913_s16  ;;  %759 = vrot.lane.b32.xlu2 %v728_v13, %s913_s16  ;;  %v745_v35 = vpop.permute.xlu0 %744 }
 0x121   : > { %v746_v36 = vunpack.i.l.bf16 %v745_v35  ;;  %v747_v41 = vunpack.i.h.bf16 %v745_v35 }
 0x128   : > { %338 = vperm.xlu1 %764, %v252_v32   ;;  %v344_v53 = vpop.permute.xlu0 %343 }
 0x172   : > { %v750_v26 = vpop.permute.xlu2 %749 }
 0x173   : > { %v752_v28 = vunpack.i.h.bf16 %v750_v26  ;;  %v751_v29 = vunpack.i.l.bf16 %v750_v26 }
 0x175   : > { %v335_v30 = vsel %vm329_vm2, %v741_v25, %v751_v29  ;;  %v334_v31 = vsel %vm329_vm2, %v742_v27, %v752_v28 }
 0x176   : > { %363 = vmatpush.msra.mxu0 %v335_v30  ;;  %650 = vmatpush.msra.mxu2 %v335_v30 }
 0x178   : > { %364 = vmatpush.msra.mxu0 %v334_v31  ;;  %651 = vmatpush.msra.mxu2 %v334_v31 }
 0x17a   : > { %v760_v37 = vpop.permute.xlu2 %759 }
 0x17b   : > { %v761_v42 = vunpack.i.l.bf16 %v760_v37  ;;  %v762_v44 = vunpack.i.h.bf16 %v760_v37 }
 0x17d   : > { %v331_v46 = vsel %vm329_vm2, %v271_v20, %v761_v42  ;;  %v330_v49 = vsel %vm329_vm2, %v270_v19, %v762_v44  ;;  %v255_v20 = vld [vmem:[%s1180_s4 + $0x8] sm:$0xff] }
 0x192   : > { %v755_v38 = vpop.permute.xlu1 %754 }
 0x193   : > { %v757_v39 = vunpack.i.h.bf16 %v755_v38  ;;  %v756_v40 = vunpack.i.l.bf16 %v755_v38 }
 0x195   : > { %v333_v43 = vsel %vm329_vm2, %v746_v36, %v756_v40  ;;  %v332_v45 = vsel %vm329_vm2, %v747_v41, %v757_v39  ;;  %v250_v39 = vld [vmem:[%s1179_s3] sm:$0xff]  ;;  %v251_v40 = vld [vmem:[%s1179_s3 + $0x8] sm:$0xff] }
 0x196   : > { %365 = vmatpush.msra.mxu0 %v333_v43  ;;  %652 = vmatpush.msra.mxu2 %v333_v43 }
 0x198   : > { %366 = vmatpush.msra.mxu0 %v332_v45  ;;  %653 = vmatpush.msra.mxu2 %v332_v45 }
 0x19a   : > { %367 = vmatpush.msra.mxu0 %v331_v46  ;;  %654 = vmatpush.msra.mxu2 %v331_v46  ;;  %v339_v50 = vpop.permute.xlu1 %338 }
 0x19c   : > { %368 = vmatpush.msra.mxu0 %v330_v49  ;;  %655 = vmatpush.msra.mxu2 %v330_v49 }
 0x19d   : > { %633 = vmatmul.msk.f32.vlgmr.msra.gmra.mxu2 %vm346_vm3, %v249_v47  ;;  %632 = vmatmul.msk.f32.vlgmr.msra.gmra.mxu0 %vm346_vm3, %v248_v48 }
 0x21a   : > { %v370_v51 = vpop.f32.mrf.mxu0 }
 0x21b   : > { %v371_v52 = vadd.f32 %v370_v51, %v339_v50 }
 0x21d   : > { %v378_v55 = vmul.f32 0.01, %v371_v52  ;;  %vm376_vm4 = vcmp.gt.f32.partialorder %v371_v52, 0.0 }
 0x21f   : > { %v380_v58 = vsel %vm376_vm4, %v371_v52, %v378_v55 }
 0x220   : > { %v373_v54 = vpop.f32.mrf.mxu2 }
 0x221   : > { %v374_v56 = vadd.f32 %v373_v54, %v344_v53 }
 0x223   : > { %vm377_vm5 = vcmp.gt.f32.partialorder %v374_v56, 0.0  ;;  %v379_v57 = vmul.f32 0.01, %v374_v56 }
 0x225   : > { %v381_v59 = vsel %vm377_vm5, %v374_v56, %v379_v57 }
 0x226   : > { %v770_v60 = vpack.i.bf16 %v380_v58, %v381_v59 }
 0x228   : > { %771 = vrot.lane.b32.xlu1 %v770_v60, %s910_s13  ;;  %766 = vrot.lane.b32.xlu2 %v770_v60, %s915_s23  ;;  %s544_s23 = sshll.u32 %s245_s9, 4  ;;  %s531_s13 = scalar_lea.sflag [#allocation4], %s1034_s12  ;;  %s545_s23 = int_to_ptr.vmem [resolvable:$true] %s544_s23 }
 0x282   : > { %v767_v61 = vpop.permute.xlu2 %766 }
 0x283   : > { %v769_v62 = vunpack.i.h.bf16 %v767_v61  ;;  %v768_v63 = vunpack.i.l.bf16 %v767_v61 }
 0x285   : > { %v414_v2 = vsel %vm266_vm0, 0.0, %v769_v62  ;;  %v415_v5 = vsel %vm266_vm0, 0.0, %v768_v63 }
 0x286   : > { %v416_v6 = vsel %vm269_vm1, %v414_v2, 0.0  ;;  %v417_v7 = vsel %vm269_vm1, %v415_v5, 0.0 }
 0x287   : > { %v780_v8 = vpack.i.bf16 %v416_v6, %v417_v7 }
 0x289   : > { %781 = vrot.lane.b32.xlu0 %v780_v8, %s912_s15  ;;  %776 = vrot.lane.b32.xlu2 %v780_v8, %s911_s29 }
 0x29a   : > { %v772_v9 = vpop.permute.xlu1 %771 }
 0x29b   : > { %v774_v10 = vunpack.i.h.bf16 %v772_v9  ;;  %v773_v11 = vunpack.i.l.bf16 %v772_v9 }
 0x29d   : > { %v390_v12 = vsel %vm266_vm0, 0.0, %v774_v10  ;;  %v391_v13 = vsel %vm266_vm0, 0.0, %v773_v11 }
 0x29e   : > { %v392_v14 = vsel %vm269_vm1, %v390_v12, 0.0  ;;  %v393_v15 = vsel %vm269_vm1, %v391_v13, 0.0 }
 0x29f   : > { %v785_v16 = vpack.i.bf16 %v392_v14, %v393_v15 }
 0x2a1   : > { %786 = vrot.lane.b32.xlu1 %v785_v16, %s911_s29  ;;  %791 = vrot.lane.b32.xlu0 %v785_v16, %s912_s15 }
 0x2a9   : > { %454 = vperm.xlu0 %763, %v254_v17  }
 0x2b1   : > { %507 = vrot.lane.b32.xlu0 %v1046_v1, %s913_s16 }
 0x2e3   : > { %v777_v18 = vpop.permute.xlu2 %776 }
 0x2e4   : > { %796 = vrot.lane.b32.xlu2 %v777_v18, %s913_s16 }
 0x2ec   : > { %806 = vrot.lane.b32.xlu2 %v780_v8, %s913_s16 }
 0x2f4   : > { %505 = vrot.lane.b32.xlu2 %v1044_v0, %s913_s16 }
 0x2fb   : > { %v782_v19 = vpop.permute.xlu0 %781 }
 0x2fc   : > { %801 = vrot.lane.b32.xlu1 %v782_v19, %s913_s16 }
 0x304   : > { %459 = vperm.xlu1 %764, %v255_v20  }
 0x313   : > { %v787_v21 = vpop.permute.xlu1 %786  ;;  %v792_v27 = vpop.permute.xlu0 %791 }
 0x314   : > { %v788_v23 = vunpack.i.l.bf16 %v787_v21  ;;  %v789_v25 = vunpack.i.h.bf16 %v787_v21  ;;  %v793_v30 = vunpack.i.l.bf16 %v792_v27  ;;  %v794_v33 = vunpack.i.h.bf16 %v792_v27 }
 0x31b   : > { %v455_v42 = vpop.permute.xlu0 %454 }
 0x323   : > { %v508_v52 = vpop.permute.xlu0 %507 }
 0x33e   : > { %v797_v22 = vpop.permute.xlu2 %796 }
 0x33f   : > { %v799_v1 = vunpack.i.h.bf16 %v797_v22  ;;  %v798_v24 = vunpack.i.l.bf16 %v797_v22 }
 0x341   : > { %v451_v26 = vsel %vm329_vm2, %v788_v23, %v798_v24  ;;  %v450_v0 = vsel %vm329_vm2, %v789_v25, %v799_v1 }
 0x342   : > { %478 = vmatpush.msra.mxu1 %v451_v26  ;;  %656 = vmatpush.msra.mxu3 %v451_v26 }
 0x344   : > { %479 = vmatpush.msra.mxu1 %v450_v0  ;;  %657 = vmatpush.msra.mxu3 %v450_v0 }
 0x346   : > { %v807_v28 = vpop.permute.xlu2 %806 }
 0x347   : > { %v808_v34 = vunpack.i.l.bf16 %v807_v28  ;;  %v809_v36 = vunpack.i.h.bf16 %v807_v28 }
 0x349   : > { %v447_v38 = vsel %vm329_vm2, %v393_v15, %v808_v34  ;;  %v446_v41 = vsel %vm329_vm2, %v392_v14, %v809_v36 }
 0x34e   : > { %v506_v44 = vpop.permute.xlu2 %505 }
 0x36e   : > { %v802_v29 = vpop.permute.xlu1 %801 }
 0x36f   : > { %v804_v31 = vunpack.i.h.bf16 %v802_v29  ;;  %v803_v32 = vunpack.i.l.bf16 %v802_v29 }
 0x371   : > { %v449_v35 = vsel %vm329_vm2, %v793_v30, %v803_v32  ;;  %v448_v37 = vsel %vm329_vm2, %v794_v33, %v804_v31 }
 0x372   : > { %480 = vmatpush.msra.mxu1 %v449_v35  ;;  %658 = vmatpush.msra.mxu3 %v449_v35 }
 0x374   : > { %481 = vmatpush.msra.mxu1 %v448_v37  ;;  %659 = vmatpush.msra.mxu3 %v448_v37 }
 0x376   : > { %482 = vmatpush.msra.mxu1 %v447_v38  ;;  %660 = vmatpush.msra.mxu3 %v447_v38  ;;  %v460_v48 = vpop.permute.xlu1 %459 }
 0x378   : > { %483 = vmatpush.msra.mxu1 %v446_v41  ;;  %661 = vmatpush.msra.mxu3 %v446_v41 }
 0x379   : > { %634 = vmatmul.msk.f32.vlgmr.msra.gmra.mxu1 %vm346_vm3, %v250_v39  ;;  %635 = vmatmul.msk.f32.vlgmr.msra.gmra.mxu3 %vm346_vm3, %v251_v40 }
 0x3f6   : > { %v485_v43 = vpop.f32.mrf.mxu1 }
 0x3f7   : > { %v486_v45 = vadd.f32 %v485_v43, %v455_v42 }
 0x3f9   : > { %v491_v46 = vadd.f32 %v486_v45, %v1051_v3  ;;  %v511_v47 = vadd.f32 %v506_v44, %v486_v45 }
 0x3fb   : > { %vm493_vm6 = vcmp.gt.f32.partialorder %v491_v46, 0.0  ;;  %v495_v49 = vmul.f32 0.01, %v491_v46  ;;  %v515_v50 = vmul.f32 0.01, %v511_v47  ;;  %vm513_vm7 = vcmp.gt.f32.partialorder %v511_v47, 0.0 }
 0x3fc   : > { %v488_v51 = vpop.f32.mrf.mxu3 }
 0x3fd   : > { %v497_v53 = vsel %vm493_vm6, %v491_v46, %v495_v49  ;;  %v489_v54 = vadd.f32 %v488_v51, %v460_v48  ;;  %v517_v55 = vsel %vm513_vm7, %v511_v47, %v515_v50 }
 0x3fe   : > { %521 = vrot.lane.b32.xlu1 %v517_v55, %s913_s16  ;;  %499 = vst.msk [vmem:[%s245_s9] sm:$0xff] %vm329_vm2, %v497_v53 }
 0x3ff   : > { %v492_v3 = vadd.f32 %v489_v54, %v1053_v4  ;;  %v512_v56 = vadd.f32 %v508_v52, %v489_v54 }
 0x401   : > { %vm494_vm8 = vcmp.gt.f32.partialorder %v492_v3, 0.0  ;;  %v496_v57 = vmul.f32 0.01, %v492_v3  ;;  %v516_v58 = vmul.f32 0.01, %v512_v56  ;;  %vm514_vm9 = vcmp.gt.f32.partialorder %v512_v56, 0.0 }
 0x403   : > { %v498_v59 = vsel %vm494_vm8, %v492_v3, %v496_v57  ;;  %v518_v60 = vsel %vm514_vm9, %v512_v56, %v516_v58 }
 0x404   : > { %523 = vrot.lane.b32.xlu2 %v518_v60, %s913_s16  ;;  %500 = vst.msk [vmem:[%s245_s9 + $0x8] sm:$0xff] %vm329_vm2, %v498_v59  ;;  %s854_s16 = sshra.s32 %s547_s25, 4  ;;  %s855_s16 = int_to_ptr.hbm [resolvable:$true] %s854_s16 }
 0x405   : > { %s856_s29 = scalar_lea.hbm %s855_s16, 32  ;;  %p861_p0 = scmp.lt.s32.totalorder %s855_s16, %s1181_s5 }
 0x406   : > { %p857_p6 = scmp.ne.s32.totalorder %s855_s16, %s856_s29  ;;  %p862_p1 = scmp.lt.s32.totalorder %s860_s17, %s856_s29 }
 0x408   : > { %p858_p9 = pnand %p857_p6, %p998_p11  ;;  %p863_p3 = por %p862_p1, %p861_p0 }
 0x40a   : > { %p859_p13 = pneg %p858_p9 }
 0x40c   : > { %p864_p4 = pnand %p863_p3, %p859_p13 }
 0x45e   : > { %v524_v61 = vpop.permute.xlu2 %523 }
 0x45f   : > { %639 = vst.msk [vmem:[%s245_s9 + $0x18] sm:$0xff] %vm329_vm2, %v524_v61 }
 0x470   : > { %v522_v4 = vpop.permute.xlu1 %521 }
 0x471   : > { %638 = vst.msk [vmem:[%s245_s9 + $0x10] sm:$0xff] %vm329_vm2, %v522_v4 }
 0x472   : > { %867 = shalt.err (!%p864_p4)
}
 0x473   : > { %s916_s12 = smov 128   ;;  %s917_s28 = smov 8  }
 0x474   : > { %664 = dma.vmem_to_hbm [thread:$0]  (%p998_p11), %s545_s23, 512, %s547_s25, %s531_s13, %s916_s12, %s916_s12, %s917_s28  }
 0x475 PF: > { %s561_s9 = sand.u32 1, %s894_s18   ;;  %p1187_p7 = scmp.ge.s32.totalorder %s906_s21, 2 }
 0x476   : > { %s562_s14 = scalar_lea.sflag [#allocation4], %s561_s9 }
 0x477   : > { %p671_p5 = pnand %p1187_p7, %p1002_p12 }
 0x479   : > { %p672_p8 = pneg %p671_p5 }
 0x47b   : > { %889 = dma.done.wait (%p672_p8), %s562_s14, 512  }
 0x47c   : > { %891 = vsyncadd (%p672_p8), %s562_s14, 4294966784  ;;  %p18_p10 = scmp.ge.s32.totalorder %s973_s24, 4   ;;  %s1188_s18 = smov %s898_s19 }
 0x47d   : > { %s1189_s19 = smov %s902_s20  ;;  %s1190_s20 = smov %s985_s27 }
 0x47e   : > { %s1191_s21 = smov %s973_s24  ;;  %20 = sbr.rel (!%p18_p10) target bundleno = 5 (0x5), region = 87 }
 0x483   :  { %568 = vsyncpa [#allocation3], 1 }
 0x484   :  { %570 = vsyncpa [#allocation3 + $0x1], 1 }
 0x485   :  { %571 = vsyncpa [#allocation4], 1 }
 0x486   :  { %573 = vsyncpa [#allocation4 + $0x1], 1 }

</bundles_post_ra>
